<compile_context>
chip_gen: v7x
topology: tpu7x:2x2x1
jax: 0.10.0
libtpu: 0.0.40
codegen_flags: <defaults>
</compile_context>

<pallas_src>
import functools
import math

import jax
import jax.numpy as jnp
from jax import lax
from jax.experimental import pallas as pl
from jax.experimental.pallas import tpu as pltpu


def _mhsa_kernel(x_ref, w_ref, b_ref, o_ref, *, num_heads, head_dim, scale,
                 attn_dtype, kv_chunk, n_chunks):
    # x_ref : (Bt, S, D)        block of Bt batch elements
    # w_ref : (D, 3*H*hd)       stacked [Wq | Wk | Wv] for all heads
    # b_ref : (1, 3*H*hd)       stacked [bq | bk | bv] for all heads
    # o_ref : (Bt, S, H*hd)     lane-dense concatenated head outputs
    H, hd = num_heads, head_dim
    Hhd = H * hd
    Bt, S, D = x_ref.shape

    # One wide Q/K/V projection for all heads and all Bt batch rows (f32 acc).
    x = x_ref[...].reshape(Bt * S, D)
    qkv = jnp.dot(x, w_ref[...], preferred_element_type=jnp.float32) + b_ref[...]

    # Scale folded into q in f32, then cast to attn_dtype (bf16 -> native MXU).
    q_all = (qkv[:, 0 * Hhd:1 * Hhd] * scale).astype(attn_dtype)
    k_all = qkv[:, 1 * Hhd:2 * Hhd].astype(attn_dtype)
    v_all = qkv[:, 2 * Hhd:3 * Hhd].astype(attn_dtype)

    # Contract the last dim of both operands (q @ k^T without a k relayout).
    dn = (((1,), (1,)), ((), ()))

    for bi in range(Bt):                 # static unroll; Bt is small
        r0 = bi * S
        for h in range(H):               # static unroll; per-head column slices
            c0 = h * hd
            q_h = q_all[r0:r0 + S, c0:c0 + hd]                      # (S, hd)

            def chunk_kv(c):
                lo = r0 + c * kv_chunk
                return (k_all[lo:lo + kv_chunk, c0:c0 + hd],
                        v_all[lo:lo + kv_chunk, c0:c0 + hd])

            # --- chunk 0: plain softmax statistics ----------------------
            k_c, v_c = chunk_kv(0)
            s = lax.dot_general(q_h, k_c, dn,
                                preferred_element_type=jnp.float32)  # (S, kc)
            m = jnp.max(s, axis=-1, keepdims=True)                   # (S, 1)
            p = jnp.exp(s - m)
            l = jnp.sum(p, axis=-1, keepdims=True)
            o = jnp.dot(p.astype(attn_dtype), v_c,
                        preferred_element_type=jnp.float32)          # (S, hd)

            # --- remaining kv chunks: flash-style online softmax --------
            for c in range(1, n_chunks):
                k_c, v_c = chunk_kv(c)
                s = lax.dot_general(q_h, k_c, dn,
                                    preferred_element_type=jnp.float32)
                m_new = jnp.maximum(m, jnp.max(s, axis=-1, keepdims=True))
                alpha = jnp.exp(m - m_new)
                p = jnp.exp(s - m_new)
                l = alpha * l + jnp.sum(p, axis=-1, keepdims=True)
                o = alpha * o + jnp.dot(p.astype(attn_dtype), v_c,
                                        preferred_element_type=jnp.float32)
                m = m_new

            # Normalize the (S, hd) result (cheaper than normalizing probs).
            o = o * pl.reciprocal(l, approx=False)

            # Head h occupies columns [h*hd, (h+1)*hd) of the concatenated
            # output == torch.cat(head_outputs, dim=-1); no transpose needed.
            o_ref[bi, :, c0:c0 + hd] = o.astype(o_ref.dtype)


def multi_head_self_attention(x, wq, wk, wv, bq, bk, bv, *,
                              attn_dtype=jnp.bfloat16,
                              block_b=None,
                              kv_chunk=None):
    """x: (B, S, D); wq/wk/wv: (H, D, hd); bq/bk/bv: (H, hd) -> (B, S, H*hd).

    Attention matmuls run in `attn_dtype` (bf16 default) with f32 accumulation
    and f32 softmax statistics.  Pass bf16 x / weights as well to also halve
    HBM traffic for the projection.
    """
    B, S, D = x.shape
    H, _, hd = wq.shape
    Hhd = H * hd
    scale = 1.0 / math.sqrt(hd)

    # Stack per-head weights into one wide (D, 3*H*hd) matrix: [Q | K | V],
    # with head h at columns h*hd:(h+1)*hd inside each third.
    def _flat(w):  # (H, D, hd) -> (D, H*hd)
        return jnp.transpose(w, (1, 0, 2)).reshape(D, Hhd)

    w_qkv = jnp.concatenate([_flat(wq), _flat(wk), _flat(wv)], axis=-1)
    b_qkv = jnp.concatenate(
        [bq.reshape(Hhd), bk.reshape(Hhd), bv.reshape(Hhd)]).reshape(1, 3 * Hhd)

    # --- tile-size heuristics -------------------------------------------
    # Pack several batch elements per grid step at small S to amortize the
    # ~0.35 us per-step overhead and fill sublanes/lanes.
    if block_b is None:
        block_b = max(1, min(B, 1024 // max(S, 1)))
    block_b = max(1, min(block_b, B))
    while B % block_b:
        block_b -= 1

    # kv chunk bounds the live per-head score block to (S, kv_chunk).
    if kv_chunk is None:
        kv_chunk = min(S, 512)
    kv_chunk = max(1, min(kv_chunk, S))
    while S % kv_chunk:
        kv_chunk -= 1
    n_chunks = S // kv_chunk

    # Explicit scoped-VMEM budget (defaults are 16/32 MiB, far below physical).
    x_item = jnp.dtype(x.dtype).itemsize
    w_item = jnp.dtype(w_qkv.dtype).itemsize
    est = (2 * block_b * S * D * x_item            # x block (double-buffered)
           + 2 * D * 3 * Hhd * w_item              # stacked weights
           + 2 * block_b * S * Hhd * x_item        # output block (double-buffered)
           + block_b * S * 3 * Hhd * (4 + 2)       # f32 qkv + attn_dtype q/k/v
           + 4 * S * max(kv_chunk, Hhd) * 4)       # per-head scores/probs/acc
    vmem_limit = int(min(128 * 2**20, max(32 * 2**20, 1.5 * est)))

    kernel = functools.partial(
        _mhsa_kernel, num_heads=H, head_dim=hd, scale=scale,
        attn_dtype=attn_dtype, kv_chunk=kv_chunk, n_chunks=n_chunks)

    return pl.pallas_call(
        kernel,
        out_shape=jax.ShapeDtypeStruct((B, S, Hhd), x.dtype),
        grid_spec=pltpu.PrefetchScalarGridSpec(
            num_scalar_prefetch=0,
            grid=(B // block_b,),
            in_specs=[
                pl.BlockSpec((block_b, S, D), lambda b: (b, 0, 0)),    # x
                pl.BlockSpec((D, 3 * Hhd), lambda b: (0, 0)),          # W_qkv (fetched once)
                pl.BlockSpec((1, 3 * Hhd), lambda b: (0, 0)),          # b_qkv (fetched once)
            ],
            out_specs=pl.BlockSpec((block_b, S, Hhd), lambda b: (b, 0, 0)),
        ),
        compiler_params=pltpu.CompilerParams(
            dimension_semantics=("parallel",),
            vmem_limit_bytes=vmem_limit),
    )(x, w_qkv, b_qkv)


def _reference(x, wq, wk, wv, bq, bk, bv):
    """Pure-JAX reference matching the PyTorch module semantics."""
    H, D, hd = wq.shape
    outs = []
    for h in range(H):
        q = x @ wq[h] + bq[h]
        k = x @ wk[h] + bk[h]
        v = x @ wv[h] + bv[h]
        s = (q @ jnp.swapaxes(k, -1, -2)) / math.sqrt(hd)
        p = jax.nn.softmax(s, axis=-1)
        outs.append(p @ v)
    return jnp.concatenate(outs, axis=-1)


if __name__ == "__main__":
    B, S, D, H = 2, 8, 32, 4
    hd = D // H

    key = jax.random.PRNGKey(0)
    kx, kq, kk, kv, kbq, kbk, kbv = jax.random.split(key, 7)

    x = jax.random.normal(kx, (B, S, D), dtype=jnp.float32)
    # deterministic synthetic parameters (nn.Linear-like fan-in scaling)
    limit = 1.0 / math.sqrt(D)
    wq = jax.random.uniform(kq, (H, D, hd), jnp.float32, -limit, limit)
    wk = jax.random.uniform(kk, (H, D, hd), jnp.float32, -limit, limit)
    wv = jax.random.uniform(kv, (H, D, hd), jnp.float32, -limit, limit)
    bq = jax.random.uniform(kbq, (H, hd), jnp.float32, -limit, limit)
    bk = jax.random.uniform(kbk, (H, hd), jnp.float32, -limit, limit)
    bv = jax.random.uniform(kbv, (H, hd), jnp.float32, -limit, limit)

    ref = _reference(x, wq, wk, wv, bq, bk, bv)

    # 1) Default path: batch-packed single kv chunk, bf16 attention matmuls.
    out = multi_head_self_attention(x, wq, wk, wv, bq, bk, bv)
    out = jax.block_until_ready(out)
    assert out.shape == (B, S, H * hd), out.shape
    # Tolerance accounts for bf16 attention operands (f32 accumulation/stats).
    assert jnp.allclose(out, ref, atol=3e-2, rtol=3e-2), "mismatch (default path)"

    # 2) Exercise the kv-chunked online-softmax (flash-style) path.
    out2 = multi_head_self_attention(x, wq, wk, wv, bq, bk, bv, kv_chunk=4)
    out2 = jax.block_until_ready(out2)
    assert jnp.allclose(out2, ref, atol=3e-2, rtol=3e-2), "mismatch (chunked path)"

    print("KERNEL_OK")
</pallas_src>

<mosaic_0001>
module attributes {stable_mosaic.version = 11 : i64} {
  func.func @_mhsa_kernel(%arg0: i32, %arg1: memref<2x8x32xf32, #tpu.memory_space<vmem>>, %arg2: memref<32x96xf32, #tpu.memory_space<vmem>>, %arg3: memref<1x96xf32, #tpu.memory_space<vmem>>, %arg4: memref<2x8x32xf32, #tpu.memory_space<vmem>>) attributes {dimension_semantics = [#tpu.dimension_semantics<parallel>], iteration_bounds = array<i64: 1>, scalar_prefetch = 0 : i64, scratch_operands = 0 : i64, tpu.core_type = #tpu.core_type<tc>, window_params = [{transform_indices = @transform_0, window_bounds = array<i64: 2, 8, 32>}, {pipeline_mode = #tpu.pipeline_mode<synchronous>, transform_indices = @transform_1, window_bounds = array<i64: 32, 96>}, {pipeline_mode = #tpu.pipeline_mode<synchronous>, transform_indices = @transform_2, window_bounds = array<i64: 1, 96>}, {transform_indices = @transform_3, window_bounds = array<i64: 2, 8, 32>}]} {
    %c0 = arith.constant 0 : index
    %c0_0 = arith.constant 0 : index
    %c0_1 = arith.constant 0 : index
    %0 = vector.load %arg1[%c0, %c0_0, %c0_1] : memref<2x8x32xf32, #tpu.memory_space<vmem>>, vector<2x8x32xf32>
    %1 = vector.shape_cast %0 : vector<2x8x32xf32> to vector<16x32xf32>
    %c0_2 = arith.constant 0 : index
    %c0_3 = arith.constant 0 : index
    %2 = vector.load %arg2[%c0_2, %c0_3] : memref<32x96xf32, #tpu.memory_space<vmem>>, vector<32x96xf32>
    %cst = arith.constant dense<0.000000e+00> : vector<16x96xf32>
    %3 = tpu.matmul %1, %2, %cst {dimension_numbers = #tpu.dot_dimension_numbers<[1], [0], [0], [1], [0, 0, 1, 1], [], []>} : vector<16x32xf32>, vector<32x96xf32>, vector<16x96xf32> -> vector<16x96xf32>
    %c0_4 = arith.constant 0 : index
    %c0_5 = arith.constant 0 : index
    %4 = vector.load %arg3[%c0_4, %c0_5] : memref<1x96xf32, #tpu.memory_space<vmem>>, vector<1x96xf32>
    %5 = vector.broadcast %4 : vector<1x96xf32> to vector<16x96xf32>
    %6 = arith.addf %3, %5 : vector<16x96xf32>
    %7 = vector.extract_strided_slice %6 {offsets = [0, 0], sizes = [16, 32], strides = [1, 1]} : vector<16x96xf32> to vector<16x32xf32>
    %cst_6 = arith.constant 0.353553385 : f32
    %8 = vector.broadcast %cst_6 : f32 to vector<16x32xf32>
    %9 = arith.mulf %7, %8 : vector<16x32xf32>
    %10 = arith.truncf %9 : vector<16x32xf32> to vector<16x32xbf16>
    %11 = vector.extract_strided_slice %6 {offsets = [0, 32], sizes = [16, 32], strides = [1, 1]} : vector<16x96xf32> to vector<16x32xf32>
    %12 = arith.truncf %11 : vector<16x32xf32> to vector<16x32xbf16>
    %13 = vector.extract_strided_slice %6 {offsets = [0, 64], sizes = [16, 32], strides = [1, 1]} : vector<16x96xf32> to vector<16x32xf32>
    %14 = arith.truncf %13 : vector<16x32xf32> to vector<16x32xbf16>
    %15 = vector.extract_strided_slice %10 {offsets = [0, 0], sizes = [8, 8], strides = [1, 1]} : vector<16x32xbf16> to vector<8x8xbf16>
    %16 = vector.extract_strided_slice %12 {offsets = [0, 0], sizes = [8, 8], strides = [1, 1]} : vector<16x32xbf16> to vector<8x8xbf16>
    %17 = vector.extract_strided_slice %14 {offsets = [0, 0], sizes = [8, 8], strides = [1, 1]} : vector<16x32xbf16> to vector<8x8xbf16>
    %cst_7 = arith.constant dense<0.000000e+00> : vector<8x8xf32>
    %18 = tpu.matmul %15, %16, %cst_7 {dimension_numbers = #tpu.dot_dimension_numbers<[1], [1], [0], [0], [0, 0, 1, 0], [], []>} : vector<8x8xbf16>, vector<8x8xbf16>, vector<8x8xf32> -> vector<8x8xf32>
    %cst_8 = arith.constant dense<0xFF800000> : vector<8xf32>
    %19 = vector.multi_reduction <maximumf>, %18, %cst_8 [1] : vector<8x8xf32> to vector<8xf32>
    %20 = vector.shape_cast %19 : vector<8xf32> to vector<8x1xf32>
    %21 = vector.broadcast %20 : vector<8x1xf32> to vector<8x8xf32>
    %22 = arith.subf %18, %21 : vector<8x8xf32>
    %23 = math.exp %22 : vector<8x8xf32>
    %cst_9 = arith.constant dense<0.000000e+00> : vector<8xf32>
    %24 = vector.multi_reduction <add>, %23, %cst_9 [1] : vector<8x8xf32> to vector<8xf32>
    %25 = vector.shape_cast %24 : vector<8xf32> to vector<8x1xf32>
    %26 = arith.truncf %23 : vector<8x8xf32> to vector<8x8xbf16>
    %cst_10 = arith.constant dense<0.000000e+00> : vector<8x8xf32>
    %27 = tpu.matmul %26, %17, %cst_10 {dimension_numbers = #tpu.dot_dimension_numbers<[1], [0], [0], [1], [0, 0, 1, 1], [], []>} : vector<8x8xbf16>, vector<8x8xbf16>, vector<8x8xf32> -> vector<8x8xf32>
    %28 = tpu.reciprocal %25 : vector<8x1xf32> -> vector<8x1xf32>
    %29 = vector.broadcast %28 : vector<8x1xf32> to vector<8x8xf32>
    %30 = arith.mulf %27, %29 : vector<8x8xf32>
    %c0_11 = arith.constant 0 : index
    %c0_12 = arith.constant 0 : index
    %c0_13 = arith.constant 0 : index
    %31 = vector.load %arg4[%c0_11, %c0_12, %c0_13] : memref<2x8x32xf32, #tpu.memory_space<vmem>>, vector<1x8x8xf32>
    %32 = vector.shape_cast %31 : vector<1x8x8xf32> to vector<8x8xf32>
    %33 = vector.shape_cast %30 : vector<8x8xf32> to vector<1x8x8xf32>
    tpu.vector_store %arg4[%c0_11, %c0_12, %c0_13], %33 {strides = array<i32>} : memref<2x8x32xf32, #tpu.memory_space<vmem>>, vector<1x8x8xf32>,
    %34 = vector.extract_strided_slice %10 {offsets = [0, 8], sizes = [8, 8], strides = [1, 1]} : vector<16x32xbf16> to vector<8x8xbf16>
    %35 = vector.extract_strided_slice %12 {offsets = [0, 8], sizes = [8, 8], strides = [1, 1]} : vector<16x32xbf16> to vector<8x8xbf16>
    %36 = vector.extract_strided_slice %14 {offsets = [0, 8], sizes = [8, 8], strides = [1, 1]} : vector<16x32xbf16> to vector<8x8xbf16>
    %cst_14 = arith.constant dense<0.000000e+00> : vector<8x8xf32>
    %37 = tpu.matmul %34, %35, %cst_14 {dimension_numbers = #tpu.dot_dimension_numbers<[1], [1], [0], [0], [0, 0, 1, 0], [], []>} : vector<8x8xbf16>, vector<8x8xbf16>, vector<8x8xf32> -> vector<8x8xf32>
    %cst_15 = arith.constant dense<0xFF800000> : vector<8xf32>
    %38 = vector.multi_reduction <maximumf>, %37, %cst_15 [1] : vector<8x8xf32> to vector<8xf32>
    %39 = vector.shape_cast %38 : vector<8xf32> to vector<8x1xf32>
    %40 = vector.broadcast %39 : vector<8x1xf32> to vector<8x8xf32>
    %41 = arith.subf %37, %40 : vector<8x8xf32>
    %42 = math.exp %41 : vector<8x8xf32>
    %cst_16 = arith.constant dense<0.000000e+00> : vector<8xf32>
    %43 = vector.multi_reduction <add>, %42, %cst_16 [1] : vector<8x8xf32> to vector<8xf32>
    %44 = vector.shape_cast %43 : vector<8xf32> to vector<8x1xf32>
    %45 = arith.truncf %42 : vector<8x8xf32> to vector<8x8xbf16>
    %cst_17 = arith.constant dense<0.000000e+00> : vector<8x8xf32>
    %46 = tpu.matmul %45, %36, %cst_17 {dimension_numbers = #tpu.dot_dimension_numbers<[1], [0], [0], [1], [0, 0, 1, 1], [], []>} : vector<8x8xbf16>, vector<8x8xbf16>, vector<8x8xf32> -> vector<8x8xf32>
    %47 = tpu.reciprocal %44 : vector<8x1xf32> -> vector<8x1xf32>
    %48 = vector.broadcast %47 : vector<8x1xf32> to vector<8x8xf32>
    %49 = arith.mulf %46, %48 : vector<8x8xf32>
    %c0_18 = arith.constant 0 : index
    %c0_19 = arith.constant 0 : index
    %c8 = arith.constant 8 : index
    %50 = vector.load %arg4[%c0_18, %c0_19, %c8] : memref<2x8x32xf32, #tpu.memory_space<vmem>>, vector<1x8x8xf32>
    %51 = vector.shape_cast %50 : vector<1x8x8xf32> to vector<8x8xf32>
    %52 = vector.shape_cast %49 : vector<8x8xf32> to vector<1x8x8xf32>
    tpu.vector_store %arg4[%c0_18, %c0_19, %c8], %52 {strides = array<i32>} : memref<2x8x32xf32, #tpu.memory_space<vmem>>, vector<1x8x8xf32>,
    %53 = vector.extract_strided_slice %10 {offsets = [0, 16], sizes = [8, 8], strides = [1, 1]} : vector<16x32xbf16> to vector<8x8xbf16>
    %54 = vector.extract_strided_slice %12 {offsets = [0, 16], sizes = [8, 8], strides = [1, 1]} : vector<16x32xbf16> to vector<8x8xbf16>
    %55 = vector.extract_strided_slice %14 {offsets = [0, 16], sizes = [8, 8], strides = [1, 1]} : vector<16x32xbf16> to vector<8x8xbf16>
    %cst_20 = arith.constant dense<0.000000e+00> : vector<8x8xf32>
    %56 = tpu.matmul %53, %54, %cst_20 {dimension_numbers = #tpu.dot_dimension_numbers<[1], [1], [0], [0], [0, 0, 1, 0], [], []>} : vector<8x8xbf16>, vector<8x8xbf16>, vector<8x8xf32> -> vector<8x8xf32>
    %cst_21 = arith.constant dense<0xFF800000> : vector<8xf32>
    %57 = vector.multi_reduction <maximumf>, %56, %cst_21 [1] : vector<8x8xf32> to vector<8xf32>
    %58 = vector.shape_cast %57 : vector<8xf32> to vector<8x1xf32>
    %59 = vector.broadcast %58 : vector<8x1xf32> to vector<8x8xf32>
    %60 = arith.subf %56, %59 : vector<8x8xf32>
    %61 = math.exp %60 : vector<8x8xf32>
    %cst_22 = arith.constant dense<0.000000e+00> : vector<8xf32>
    %62 = vector.multi_reduction <add>, %61, %cst_22 [1] : vector<8x8xf32> to vector<8xf32>
    %63 = vector.shape_cast %62 : vector<8xf32> to vector<8x1xf32>
    %64 = arith.truncf %61 : vector<8x8xf32> to vector<8x8xbf16>
    %cst_23 = arith.constant dense<0.000000e+00> : vector<8x8xf32>
    %65 = tpu.matmul %64, %55, %cst_23 {dimension_numbers = #tpu.dot_dimension_numbers<[1], [0], [0], [1], [0, 0, 1, 1], [], []>} : vector<8x8xbf16>, vector<8x8xbf16>, vector<8x8xf32> -> vector<8x8xf32>
    %66 = tpu.reciprocal %63 : vector<8x1xf32> -> vector<8x1xf32>
    %67 = vector.broadcast %66 : vector<8x1xf32> to vector<8x8xf32>
    %68 = arith.mulf %65, %67 : vector<8x8xf32>
    %c0_24 = arith.constant 0 : index
    %c0_25 = arith.constant 0 : index
    %c16 = arith.constant 16 : index
    %69 = vector.load %arg4[%c0_24, %c0_25, %c16] : memref<2x8x32xf32, #tpu.memory_space<vmem>>, vector<1x8x8xf32>
    %70 = vector.shape_cast %69 : vector<1x8x8xf32> to vector<8x8xf32>
    %71 = vector.shape_cast %68 : vector<8x8xf32> to vector<1x8x8xf32>
    tpu.vector_store %arg4[%c0_24, %c0_25, %c16], %71 {strides = array<i32>} : memref<2x8x32xf32, #tpu.memory_space<vmem>>, vector<1x8x8xf32>,
    %72 = vector.extract_strided_slice %10 {offsets = [0, 24], sizes = [8, 8], strides = [1, 1]} : vector<16x32xbf16> to vector<8x8xbf16>
    %73 = vector.extract_strided_slice %12 {offsets = [0, 24], sizes = [8, 8], strides = [1, 1]} : vector<16x32xbf16> to vector<8x8xbf16>
    %74 = vector.extract_strided_slice %14 {offsets = [0, 24], sizes = [8, 8], strides = [1, 1]} : vector<16x32xbf16> to vector<8x8xbf16>
    %cst_26 = arith.constant dense<0.000000e+00> : vector<8x8xf32>
    %75 = tpu.matmul %72, %73, %cst_26 {dimension_numbers = #tpu.dot_dimension_numbers<[1], [1], [0], [0], [0, 0, 1, 0], [], []>} : vector<8x8xbf16>, vector<8x8xbf16>, vector<8x8xf32> -> vector<8x8xf32>
    %cst_27 = arith.constant dense<0xFF800000> : vector<8xf32>
    %76 = vector.multi_reduction <maximumf>, %75, %cst_27 [1] : vector<8x8xf32> to vector<8xf32>
    %77 = vector.shape_cast %76 : vector<8xf32> to vector<8x1xf32>
    %78 = vector.broadcast %77 : vector<8x1xf32> to vector<8x8xf32>
    %79 = arith.subf %75, %78 : vector<8x8xf32>
    %80 = math.exp %79 : vector<8x8xf32>
    %cst_28 = arith.constant dense<0.000000e+00> : vector<8xf32>
    %81 = vector.multi_reduction <add>, %80, %cst_28 [1] : vector<8x8xf32> to vector<8xf32>
    %82 = vector.shape_cast %81 : vector<8xf32> to vector<8x1xf32>
    %83 = arith.truncf %80 : vector<8x8xf32> to vector<8x8xbf16>
    %cst_29 = arith.constant dense<0.000000e+00> : vector<8x8xf32>
    %84 = tpu.matmul %83, %74, %cst_29 {dimension_numbers = #tpu.dot_dimension_numbers<[1], [0], [0], [1], [0, 0, 1, 1], [], []>} : vector<8x8xbf16>, vector<8x8xbf16>, vector<8x8xf32> -> vector<8x8xf32>
    %85 = tpu.reciprocal %82 : vector<8x1xf32> -> vector<8x1xf32>
    %86 = vector.broadcast %85 : vector<8x1xf32> to vector<8x8xf32>
    %87 = arith.mulf %84, %86 : vector<8x8xf32>
    %c0_30 = arith.constant 0 : index
    %c0_31 = arith.constant 0 : index
    %c24 = arith.constant 24 : index
    %88 = vector.load %arg4[%c0_30, %c0_31, %c24] : memref<2x8x32xf32, #tpu.memory_space<vmem>>, vector<1x8x8xf32>
    %89 = vector.shape_cast %88 : vector<1x8x8xf32> to vector<8x8xf32>
    %90 = vector.shape_cast %87 : vector<8x8xf32> to vector<1x8x8xf32>
    tpu.vector_store %arg4[%c0_30, %c0_31, %c24], %90 {strides = array<i32>} : memref<2x8x32xf32, #tpu.memory_space<vmem>>, vector<1x8x8xf32>,
    %91 = vector.extract_strided_slice %10 {offsets = [8, 0], sizes = [8, 8], strides = [1, 1]} : vector<16x32xbf16> to vector<8x8xbf16>
    %92 = vector.extract_strided_slice %12 {offsets = [8, 0], sizes = [8, 8], strides = [1, 1]} : vector<16x32xbf16> to vector<8x8xbf16>
    %93 = vector.extract_strided_slice %14 {offsets = [8, 0], sizes = [8, 8], strides = [1, 1]} : vector<16x32xbf16> to vector<8x8xbf16>
    %cst_32 = arith.constant dense<0.000000e+00> : vector<8x8xf32>
    %94 = tpu.matmul %91, %92, %cst_32 {dimension_numbers = #tpu.dot_dimension_numbers<[1], [1], [0], [0], [0, 0, 1, 0], [], []>} : vector<8x8xbf16>, vector<8x8xbf16>, vector<8x8xf32> -> vector<8x8xf32>
    %cst_33 = arith.constant dense<0xFF800000> : vector<8xf32>
    %95 = vector.multi_reduction <maximumf>, %94, %cst_33 [1] : vector<8x8xf32> to vector<8xf32>
    %96 = vector.shape_cast %95 : vector<8xf32> to vector<8x1xf32>
    %97 = vector.broadcast %96 : vector<8x1xf32> to vector<8x8xf32>
    %98 = arith.subf %94, %97 : vector<8x8xf32>
    %99 = math.exp %98 : vector<8x8xf32>
    %cst_34 = arith.constant dense<0.000000e+00> : vector<8xf32>
    %100 = vector.multi_reduction <add>, %99, %cst_34 [1] : vector<8x8xf32> to vector<8xf32>
    %101 = vector.shape_cast %100 : vector<8xf32> to vector<8x1xf32>
    %102 = arith.truncf %99 : vector<8x8xf32> to vector<8x8xbf16>
    %cst_35 = arith.constant dense<0.000000e+00> : vector<8x8xf32>
    %103 = tpu.matmul %102, %93, %cst_35 {dimension_numbers = #tpu.dot_dimension_numbers<[1], [0], [0], [1], [0, 0, 1, 1], [], []>} : vector<8x8xbf16>, vector<8x8xbf16>, vector<8x8xf32> -> vector<8x8xf32>
    %104 = tpu.reciprocal %101 : vector<8x1xf32> -> vector<8x1xf32>
    %105 = vector.broadcast %104 : vector<8x1xf32> to vector<8x8xf32>
    %106 = arith.mulf %103, %105 : vector<8x8xf32>
    %c1 = arith.constant 1 : index
    %c0_36 = arith.constant 0 : index
    %c0_37 = arith.constant 0 : index
    %107 = vector.load %arg4[%c1, %c0_36, %c0_37] : memref<2x8x32xf32, #tpu.memory_space<vmem>>, vector<1x8x8xf32>
    %108 = vector.shape_cast %107 : vector<1x8x8xf32> to vector<8x8xf32>
    %109 = vector.shape_cast %106 : vector<8x8xf32> to vector<1x8x8xf32>
    tpu.vector_store %arg4[%c1, %c0_36, %c0_37], %109 {strides = array<i32>} : memref<2x8x32xf32, #tpu.memory_space<vmem>>, vector<1x8x8xf32>,
    %110 = vector.extract_strided_slice %10 {offsets = [8, 8], sizes = [8, 8], strides = [1, 1]} : vector<16x32xbf16> to vector<8x8xbf16>
    %111 = vector.extract_strided_slice %12 {offsets = [8, 8], sizes = [8, 8], strides = [1, 1]} : vector<16x32xbf16> to vector<8x8xbf16>
    %112 = vector.extract_strided_slice %14 {offsets = [8, 8], sizes = [8, 8], strides = [1, 1]} : vector<16x32xbf16> to vector<8x8xbf16>
    %cst_38 = arith.constant dense<0.000000e+00> : vector<8x8xf32>
    %113 = tpu.matmul %110, %111, %cst_38 {dimension_numbers = #tpu.dot_dimension_numbers<[1], [1], [0], [0], [0, 0, 1, 0], [], []>} : vector<8x8xbf16>, vector<8x8xbf16>, vector<8x8xf32> -> vector<8x8xf32>
    %cst_39 = arith.constant dense<0xFF800000> : vector<8xf32>
    %114 = vector.multi_reduction <maximumf>, %113, %cst_39 [1] : vector<8x8xf32> to vector<8xf32>
    %115 = vector.shape_cast %114 : vector<8xf32> to vector<8x1xf32>
    %116 = vector.broadcast %115 : vector<8x1xf32> to vector<8x8xf32>
    %117 = arith.subf %113, %116 : vector<8x8xf32>
    %118 = math.exp %117 : vector<8x8xf32>
    %cst_40 = arith.constant dense<0.000000e+00> : vector<8xf32>
    %119 = vector.multi_reduction <add>, %118, %cst_40 [1] : vector<8x8xf32> to vector<8xf32>
    %120 = vector.shape_cast %119 : vector<8xf32> to vector<8x1xf32>
    %121 = arith.truncf %118 : vector<8x8xf32> to vector<8x8xbf16>
    %cst_41 = arith.constant dense<0.000000e+00> : vector<8x8xf32>
    %122 = tpu.matmul %121, %112, %cst_41 {dimension_numbers = #tpu.dot_dimension_numbers<[1], [0], [0], [1], [0, 0, 1, 1], [], []>} : vector<8x8xbf16>, vector<8x8xbf16>, vector<8x8xf32> -> vector<8x8xf32>
    %123 = tpu.reciprocal %120 : vector<8x1xf32> -> vector<8x1xf32>
    %124 = vector.broadcast %123 : vector<8x1xf32> to vector<8x8xf32>
    %125 = arith.mulf %122, %124 : vector<8x8xf32>
    %c1_42 = arith.constant 1 : index
    %c0_43 = arith.constant 0 : index
    %c8_44 = arith.constant 8 : index
    %126 = vector.load %arg4[%c1_42, %c0_43, %c8_44] : memref<2x8x32xf32, #tpu.memory_space<vmem>>, vector<1x8x8xf32>
    %127 = vector.shape_cast %126 : vector<1x8x8xf32> to vector<8x8xf32>
    %128 = vector.shape_cast %125 : vector<8x8xf32> to vector<1x8x8xf32>
    tpu.vector_store %arg4[%c1_42, %c0_43, %c8_44], %128 {strides = array<i32>} : memref<2x8x32xf32, #tpu.memory_space<vmem>>, vector<1x8x8xf32>,
    %129 = vector.extract_strided_slice %10 {offsets = [8, 16], sizes = [8, 8], strides = [1, 1]} : vector<16x32xbf16> to vector<8x8xbf16>
    %130 = vector.extract_strided_slice %12 {offsets = [8, 16], sizes = [8, 8], strides = [1, 1]} : vector<16x32xbf16> to vector<8x8xbf16>
    %131 = vector.extract_strided_slice %14 {offsets = [8, 16], sizes = [8, 8], strides = [1, 1]} : vector<16x32xbf16> to vector<8x8xbf16>
    %cst_45 = arith.constant dense<0.000000e+00> : vector<8x8xf32>
    %132 = tpu.matmul %129, %130, %cst_45 {dimension_numbers = #tpu.dot_dimension_numbers<[1], [1], [0], [0], [0, 0, 1, 0], [], []>} : vector<8x8xbf16>, vector<8x8xbf16>, vector<8x8xf32> -> vector<8x8xf32>
    %cst_46 = arith.constant dense<0xFF800000> : vector<8xf32>
    %133 = vector.multi_reduction <maximumf>, %132, %cst_46 [1] : vector<8x8xf32> to vector<8xf32>
    %134 = vector.shape_cast %133 : vector<8xf32> to vector<8x1xf32>
    %135 = vector.broadcast %134 : vector<8x1xf32> to vector<8x8xf32>
    %136 = arith.subf %132, %135 : vector<8x8xf32>
    %137 = math.exp %136 : vector<8x8xf32>
    %cst_47 = arith.constant dense<0.000000e+00> : vector<8xf32>
    %138 = vector.multi_reduction <add>, %137, %cst_47 [1] : vector<8x8xf32> to vector<8xf32>
    %139 = vector.shape_cast %138 : vector<8xf32> to vector<8x1xf32>
    %140 = arith.truncf %137 : vector<8x8xf32> to vector<8x8xbf16>
    %cst_48 = arith.constant dense<0.000000e+00> : vector<8x8xf32>
    %141 = tpu.matmul %140, %131, %cst_48 {dimension_numbers = #tpu.dot_dimension_numbers<[1], [0], [0], [1], [0, 0, 1, 1], [], []>} : vector<8x8xbf16>, vector<8x8xbf16>, vector<8x8xf32> -> vector<8x8xf32>
    %142 = tpu.reciprocal %139 : vector<8x1xf32> -> vector<8x1xf32>
    %143 = vector.broadcast %142 : vector<8x1xf32> to vector<8x8xf32>
    %144 = arith.mulf %141, %143 : vector<8x8xf32>
    %c1_49 = arith.constant 1 : index
    %c0_50 = arith.constant 0 : index
    %c16_51 = arith.constant 16 : index
    %145 = vector.load %arg4[%c1_49, %c0_50, %c16_51] : memref<2x8x32xf32, #tpu.memory_space<vmem>>, vector<1x8x8xf32>
    %146 = vector.shape_cast %145 : vector<1x8x8xf32> to vector<8x8xf32>
    %147 = vector.shape_cast %144 : vector<8x8xf32> to vector<1x8x8xf32>
    tpu.vector_store %arg4[%c1_49, %c0_50, %c16_51], %147 {strides = array<i32>} : memref<2x8x32xf32, #tpu.memory_space<vmem>>, vector<1x8x8xf32>,
    %148 = vector.extract_strided_slice %10 {offsets = [8, 24], sizes = [8, 8], strides = [1, 1]} : vector<16x32xbf16> to vector<8x8xbf16>
    %149 = vector.extract_strided_slice %12 {offsets = [8, 24], sizes = [8, 8], strides = [1, 1]} : vector<16x32xbf16> to vector<8x8xbf16>
    %150 = vector.extract_strided_slice %14 {offsets = [8, 24], sizes = [8, 8], strides = [1, 1]} : vector<16x32xbf16> to vector<8x8xbf16>
    %cst_52 = arith.constant dense<0.000000e+00> : vector<8x8xf32>
    %151 = tpu.matmul %148, %149, %cst_52 {dimension_numbers = #tpu.dot_dimension_numbers<[1], [1], [0], [0], [0, 0, 1, 0], [], []>} : vector<8x8xbf16>, vector<8x8xbf16>, vector<8x8xf32> -> vector<8x8xf32>
    %cst_53 = arith.constant dense<0xFF800000> : vector<8xf32>
    %152 = vector.multi_reduction <maximumf>, %151, %cst_53 [1] : vector<8x8xf32> to vector<8xf32>
    %153 = vector.shape_cast %152 : vector<8xf32> to vector<8x1xf32>
    %154 = vector.broadcast %153 : vector<8x1xf32> to vector<8x8xf32>
    %155 = arith.subf %151, %154 : vector<8x8xf32>
    %156 = math.exp %155 : vector<8x8xf32>
    %cst_54 = arith.constant dense<0.000000e+00> : vector<8xf32>
    %157 = vector.multi_reduction <add>, %156, %cst_54 [1] : vector<8x8xf32> to vector<8xf32>
    %158 = vector.shape_cast %157 : vector<8xf32> to vector<8x1xf32>
    %159 = arith.truncf %156 : vector<8x8xf32> to vector<8x8xbf16>
    %cst_55 = arith.constant dense<0.000000e+00> : vector<8x8xf32>
    %160 = tpu.matmul %159, %150, %cst_55 {dimension_numbers = #tpu.dot_dimension_numbers<[1], [0], [0], [1], [0, 0, 1, 1], [], []>} : vector<8x8xbf16>, vector<8x8xbf16>, vector<8x8xf32> -> vector<8x8xf32>
    %161 = tpu.reciprocal %158 : vector<8x1xf32> -> vector<8x1xf32>
    %162 = vector.broadcast %161 : vector<8x1xf32> to vector<8x8xf32>
    %163 = arith.mulf %160, %162 : vector<8x8xf32>
    %c1_56 = arith.constant 1 : index
    %c0_57 = arith.constant 0 : index
    %c24_58 = arith.constant 24 : index
    %164 = vector.load %arg4[%c1_56, %c0_57, %c24_58] : memref<2x8x32xf32, #tpu.memory_space<vmem>>, vector<1x8x8xf32>
    %165 = vector.shape_cast %164 : vector<1x8x8xf32> to vector<8x8xf32>
    %166 = vector.shape_cast %163 : vector<8x8xf32> to vector<1x8x8xf32>
    tpu.vector_store %arg4[%c1_56, %c0_57, %c24_58], %166 {strides = array<i32>} : memref<2x8x32xf32, #tpu.memory_space<vmem>>, vector<1x8x8xf32>,
    return
  }
  func.func @transform_0(%arg0: i32) -> (i32, i32, i32) {
    %c0_i32 = arith.constant 0 : i32
    %c0_i32_0 = arith.constant 0 : i32
    %c0_i32_1 = arith.constant 0 : i32
    return %arg0, %c0_i32, %c0_i32_0 : i32, i32, i32
  }
  func.func @transform_1(%arg0: i32) -> (i32, i32) {
    %c0_i32 = arith.constant 0 : i32
    %c0_i32_0 = arith.constant 0 : i32
    %c0_i32_1 = arith.constant 0 : i32
    return %c0_i32, %c0_i32_0 : i32, i32
  }
  func.func @transform_2(%arg0: i32) -> (i32, i32) {
    %c0_i32 = arith.constant 0 : i32
    %c0_i32_0 = arith.constant 0 : i32
    %c0_i32_1 = arith.constant 0 : i32
    return %c0_i32, %c0_i32_0 : i32, i32
  }
  func.func @transform_3(%arg0: i32) -> (i32, i32, i32) {
    %c0_i32 = arith.constant 0 : i32
    %c0_i32_0 = arith.constant 0 : i32
    %c0_i32_1 = arith.constant 0 : i32
    return %arg0, %c0_i32, %c0_i32_0 : i32, i32, i32
  }
}

</mosaic_0001>

<bundles_post_ra>
// kernel: tpu_custom_call.1
= control target key start
LH: loop header
LB: loop body
LE: loop exit
PB: predicated region body
PF: predicated region fallthrough
CT: control target
= control target key end

     0   :  { %8 = vsyncpa [#allocation3], 0  ;;  %s1618_s0 = inlined_call_operand.hbm [shape: f32[2,8,32], index: 0, kind: input, shape index: {}]   ;;  %s1619_s1 = inlined_call_operand.hbm [shape: f32[32,96], index: 1, kind: input, shape index: {}]   ;;  %s1620_s2 = inlined_call_operand.vmem [shape: f32[1,96], index: 2, kind: input, shape index: {}]   ;;  %s1621_s3 = inlined_call_operand.hbm [shape: f32[2,8,32], index: 3, kind: output, shape index: {}]  }
   0x1   :  { %9 = vsyncpa [#allocation6], 0 }
   0x2   :  { %10 = vsyncpa [#allocation4], 0  ;;  %s1375_s12 = smov [#allocation2]   ;;  %s1303_s16 = scalar_lea.hbm %s1618_s0, 256 }
   0x3   :  { %s16_s13 = sshll.u32 %s1375_s12, 4  ;;  %p1304_p0 = scmp.ne.s32.totalorder %s1618_s0, %s1303_s16  ;;  %s17_s13 = int_to_ptr.vmem [resolvable:$true] %s16_s13 }
   0x4   :  { %p1307_p1 = scmp.lt.u32.totalorder %s1303_s16, %s1618_s0 }
   0x6   :  { %p1309_p2 = pnand %p1307_p1, %p1304_p0 }
   0x8   :  { %1312 = shalt.err (!%p1309_p2)
}
   0x9   :  { %s1313_s21 = scalar_lea.vmem %s17_s13, 256  ;;  %p1318_p4 = scmp.lt.s32.totalorder %s17_s13, %s17_s13 }
   0xa   :  { %p1314_p3 = scmp.ne.s32.totalorder %s17_s13, %s1313_s21  ;;  %p1319_p5 = scmp.lt.s32.totalorder %s1313_s21, %s1313_s21 }
   0xc   :  { %p1320_p6 = por %p1319_p5, %p1318_p4 }
   0xe   :  { %p1321_p7 = pnand %p1320_p6, %p1314_p3 }
  0x10   :  { %1324 = shalt.err (!%p1321_p7)
}
  0x11   :  { %s1376_s22 = smov 128   ;;  %s1377_s23 = smov 8  }
  0x12   :  { %22 = dma.hbm_to_vmem [thread:$0]  %s1618_s0, 256, %s17_s13, [#allocation3], %s1376_s22, %s1376_s22, %s1377_s23  }
  0x13   :  { %s1378_s26 = smov [#allocation5]   ;;  %s1325_s30 = scalar_lea.hbm %s1619_s1, 512 }
  0x14   :  { %s28_s27 = sshll.u32 %s1378_s26, 4  ;;  %p1326_p8 = scmp.ne.s32.totalorder %s1619_s1, %s1325_s30  ;;  %s29_s27 = int_to_ptr.vmem [resolvable:$true] %s28_s27 }
  0x15   :  { %p1329_p9 = scmp.lt.u32.totalorder %s1325_s30, %s1619_s1 }
  0x17   :  { %p1331_p10 = pnand %p1329_p9, %p1326_p8 }
  0x19   :  { %1334 = shalt.err (!%p1331_p10)
}
  0x1a   :  { %s1335_s8 = scalar_lea.vmem %s29_s27, 512  ;;  %p1340_p12 = scmp.lt.s32.totalorder %s29_s27, %s29_s27 }
  0x1b   :  { %p1336_p11 = scmp.ne.s32.totalorder %s29_s27, %s1335_s8  ;;  %p1341_p13 = scmp.lt.s32.totalorder %s1335_s8, %s1335_s8 }
  0x1d   :  { %p1342_p0 = por %p1341_p13, %p1340_p12 }
  0x1f   :  { %p1343_p1 = pnand %p1342_p0, %p1336_p11 }
  0x21   :  { %1346 = shalt.err (!%p1343_p1)
}
  0x22   :  { %34 = dma.hbm_to_vmem [thread:$0]  %s1619_s1, 512, %s29_s27, [#allocation6], %s1376_s22, %s1376_s22, %s1377_s23  }
  0x23   :  { %1369 = dma.done.wait [#allocation3], 256  }
  0x24   :  { %1370 = vsyncadd [#allocation3], 4294967040 }
  0x25   :  { %1371 = dma.done.wait [#allocation6], 512  }
  0x26   :  { %1372 = vsyncadd [#allocation6], 4294966784  ;;  %vm57_vm0 = vcmask 261120   ;;  %v46_v0 = vld [vmem:[#allocation5] sm:$0xff]  ;;  %v47_v1 = vld [vmem:[#allocation5 + $0x8] sm:$0xff]  ;;  %v1379_v8 = vmov 0.0  }
  0x27   :  { %v48_v2 = vld [vmem:[#allocation5 + $0x10] sm:$0xff]  ;;  %v1243_v3 = vpack.c.bf16 %v47_v1, %v46_v0  ;;  %v49_v4 = vld [vmem:[#allocation5 + $0x18] sm:$0xff]  ;;  %1147 = vmatprep.subr.bf16.mxu1 %v1379_v8  ;;  %vm1380_vm1 = vmmov 0   ;;  %s1381_s11 = smov 96   ;;  %s1383_s12 = smov 88   ;;  %vm146_vm2 = vcmask 64512  }
  0x28   :  { %v44_v5 = vld [vmem:[#allocation2] sm:$0xff]  ;;  %v1247_v6 = vpack.c.bf16 %v49_v4, %v48_v2  ;;  %v45_v7 = vld [vmem:[#allocation2 + $0x8] sm:$0xff]  ;;  %1149 = vmatprep.mubr.msk.bf16.mxu1 %vm1380_vm1, %v1379_v8  ;;  %s1384_s13 = smov 80   ;;  %s1385_s14 = smov 112   ;;  %vm208_vm3 = vcmask 1043456   ;;  %vm370_vm4 = vcmask 130112  }
  0x29   :  { %1144 = vmatprep.mubr.msk.f32.mxu0 %vm57_vm0, %v44_v5  ;;  %1244 = vmatprep.subr.bf16.mxu0 %v1243_v3  ;;  %v1079_v9 = vld [vmem:[%s1620_s2] ss:$0 sm:$0xff]  ;;  %s1382_s2 = smov 120   ;;  %s1386_s15 = smov 72   ;;  %vm486_vm5 = vcmask 195712   ;;  %vm602_vm6 = vcmask 261312  }
  0x2a   :  { %1246 = vmatpush3.bf16.msra.mxu0 %v1243_v3  ;;  %s1387_s16 = smov 104   ;;  %s1388_s17 = smov 56  }
  0x2b   :  { %1248 = vmatprep.subr.bf16.mxu0 %v1247_v6  ;;  %s1389_s18 = smov 64   ;;  %s1390_s19 = smov 48  }
  0x2c   :  { %s1391_s20 = smov 40   ;;  %s1392_s21 = smov 16  }
  0x2d   :  { %s1393_s24 = smov 24   ;;  %s1394_s25 = smov [#allocation7]  }
  0x2e   :  { %1250 = vmatpush3.bf16.msra.mxu0 %v1247_v6  ;;  %s1066_s26 = sshll.u32 %s1394_s25, 4  ;;  %s1067_s26 = int_to_ptr.vmem [resolvable:$true] %s1066_s26 }
  0x2f   :  { %1153 = vmatprep.subr.bf16.mxu0 %v1379_v8  ;;  %s1347_s27 = scalar_lea.vmem %s1067_s26, 256  ;;  %p1352_p3 = scmp.lt.s32.totalorder %s1067_s26, %s1067_s26 }
  0x30   :  { %p1348_p2 = scmp.ne.s32.totalorder %s1067_s26, %s1347_s27  ;;  %p1353_p4 = scmp.lt.s32.totalorder %s1347_s27, %s1347_s27 }
  0x31   :  { %1145 = vmatmul.mubr.msk.f32.vlgmr.msra.gmra.mrb[0].mxu0 %vm57_vm0, %v45_v7 }
  0x32   :  { %1155 = vmatprep.mubr.msk.bf16.mxu0 %vm1380_vm1, %v1379_v8  ;;  %p1354_p5 = por %p1353_p4, %p1352_p3 }
  0x34   :  { %p1355_p6 = pnand %p1354_p5, %p1348_p2 }
 0x104   :  { %v1146_v10 = vpop.f32.mrb[0].mxu0 }
 0x105   :  { %v136_v11 = vadd.f32 %v1146_v10, %v1079_v9  ;;  %v130_v12 = vpop.f32.mrb[1].mxu0 }
 0x106   :  { %v131_v13 = vadd.f32 %v1079_v9, %v130_v12 }
 0x107   :  { %v140_v14 = vmul.f32 0.35355338, %v136_v11 }
 0x108   :  { %v139_v15 = vmul.f32 0.35355338, %v131_v13  ;;  %v1454_v16 = vpack.c.bf16 %v136_v11, %v131_v13 }
 0x10a   :  { %v141_v17 = vpack.c.bf16 %v140_v14, %v139_v15  ;;  %144 = vrot.lane.b32.xlu0 %v1454_v16, %s1381_s11  ;;  %v1461_v18 = vrot.slane %v1454_v16, 4 }
 0x10c   :  { %256 = vrot.lane.b32.xlu1 %v141_v17, %s1382_s2  ;;  %v604_v19 = vrot.slane %v141_v17, 4 }
 0x10e   :  { %258 = vrot.lane.b32.xlu0 %v1454_v16, %s1383_s12 }
 0x110   :  { %374 = vrot.lane.b32.xlu1 %v1454_v16, %s1384_s13 }
 0x112   :  { %372 = vrot.lane.b32.xlu0 %v141_v17, %s1385_s14 }
 0x114   :  { %490 = vrot.lane.b32.xlu1 %v1454_v16, %s1386_s15 }
 0x116   :  { %488 = vrot.lane.b32.xlu0 %v141_v17, %s1387_s16 }
 0x118   :  { %606 = vrot.lane.b32.xlu1 %v1461_v18, %s1381_s11 }
 0x11a   :  { %718 = vrot.lane.b32.xlu0 %v1461_v18, %s1383_s12 }
 0x11c   :  { %716 = vrot.lane.b32.xlu1 %v604_v19, %s1382_s2 }
 0x11e   :  { %833 = vrot.lane.b32.xlu0 %v1461_v18, %s1384_s13 }
 0x120   :  { %831 = vrot.lane.b32.xlu1 %v604_v19, %s1385_s14 }
 0x122   :  { %948 = vrot.lane.b32.xlu0 %v1461_v18, %s1386_s15 }
 0x124   :  { %946 = vrot.lane.b32.xlu1 %v604_v19, %s1387_s16 }
 0x126   :  { %316 = vrot.lane.b32.xlu0 %v1454_v16, %s1388_s17 }
 0x128   :  { %203 = vrot.lane.b32.xlu1 %v1454_v16, %s1389_s18 }
 0x17c   :  { %v145_v20 = vpop.permute.xlu0 %144 }
 0x17d   :  { %v151_v21 = vsel %vm146_vm2, %v145_v20, 0 }
 0x17e   :  { %1148 = vmatpush3.bf16.xpose.msra.mxu1 %v151_v21  ;;  %v257_v22 = vpop.permute.xlu1 %256 }
 0x17f   :  { %1159 = vmatprep.subr.bf16.mxu1 %v1379_v8 }
 0x180   :  { %v259_v23 = vpop.permute.xlu0 %258 }
 0x181   :  { %v264_v25 = vsel %vm146_vm2, %v259_v23, 0 }
 0x182   :  { %v375_v24 = vpop.permute.xlu1 %374 }
 0x183   :  { %v380_v28 = vsel %vm146_vm2, %v375_v24, 0 }
 0x184   :  { %v373_v31 = vpop.permute.xlu0 %372 }
 0x185   :  { %1150 = vmatmul.mubr.msk.bf16.vlgmr.msra.gmra.mrb[0].mxu1 %vm146_vm2, %v141_v17 }
 0x186   :  { %v491_v26 = vpop.permute.xlu1 %490  ;;  %1160 = vmatpush3.bf16.xpose.msra.mxu1 %v264_v25  ;;  %1161 = vmatprep.mubr.msk.bf16.mxu1 %vm1380_vm1, %v1379_v8 }
 0x187   :  { %1171 = vmatprep.subr.bf16.mxu1 %v1379_v8  ;;  %v496_v32 = vsel %vm146_vm2, %v491_v26, 0 }
 0x188   :  { %v489_v36 = vpop.permute.xlu0 %488 }
 0x18a   :  { %v607_v27 = vpop.permute.xlu1 %606 }
 0x18b   :  { %v612_v37 = vsel %vm146_vm2, %v607_v27, 0 }
 0x18c   :  { %v719_v38 = vpop.permute.xlu0 %718 }
 0x18d   :  { %1162 = vmatmul.mubr.msk.bf16.vlgmr.msra.gmra.mrb[4].mxu1 %vm146_vm2, %v257_v22  ;;  %v724_v39 = vsel %vm146_vm2, %v719_v38, 0 }
 0x18e   :  { %v717_v29 = vpop.permute.xlu1 %716  ;;  %1172 = vmatpush3.bf16.xpose.msra.mxu1 %v380_v28  ;;  %1173 = vmatprep.mubr.msk.bf16.mxu1 %vm1380_vm1, %v1379_v8 }
 0x18f   :  { %1183 = vmatprep.subr.bf16.mxu1 %v1379_v8 }
 0x190   :  { %v834_v40 = vpop.permute.xlu0 %833 }
 0x191   :  { %v839_v41 = vsel %vm146_vm2, %v834_v40, 0 }
 0x192   :  { %v832_v30 = vpop.permute.xlu1 %831 }
 0x194   :  { %v949_v42 = vpop.permute.xlu0 %948 }
 0x195   :  { %1174 = vmatmul.mubr.msk.bf16.vlgmr.msra.gmra.mrb[8].mxu1 %vm146_vm2, %v373_v31  ;;  %v954_v43 = vsel %vm146_vm2, %v949_v42, 0 }
 0x196   :  { %v947_v33 = vpop.permute.xlu1 %946  ;;  %1184 = vmatpush3.bf16.xpose.msra.mxu1 %v496_v32  ;;  %1185 = vmatprep.mubr.msk.bf16.mxu1 %vm1380_vm1, %v1379_v8 }
 0x197   :  { %1195 = vmatprep.subr.bf16.mxu1 %v1379_v8 }
 0x198   :  { %v317_v22 = vpop.permute.xlu0 %316 }
 0x199   :  { %v322_v31 = vsel %vm208_vm3, %v317_v22, 0 }
 0x19a   :  { %v204_v34 = vpop.permute.xlu1 %203 }
 0x19b   :  { %v210_v35 = vsel %vm208_vm3, %v204_v34, 0 }
 0x19c   :  { %1154 = vmatpush3.bf16.msra.mxu0 %v210_v35 }
 0x19d   :  { %1186 = vmatmul.mubr.msk.bf16.vlgmr.msra.gmra.mrb[12].mxu1 %vm146_vm2, %v489_v36  ;;  %1165 = vmatprep.subr.bf16.mxu0 %v1379_v8 }
 0x19e   :  { %1196 = vmatpush3.bf16.xpose.msra.mxu1 %v612_v37  ;;  %1197 = vmatprep.mubr.msk.bf16.mxu1 %vm1380_vm1, %v1379_v8 }
 0x19f   :  { %1207 = vmatprep.subr.bf16.mxu1 %v1379_v8 }
 0x1a5   :  { %1198 = vmatmul.mubr.msk.bf16.vlgmr.msra.gmra.mrb[16].mxu1 %vm146_vm2, %v604_v19 }
 0x1a6   :  { %1208 = vmatpush3.bf16.xpose.msra.mxu1 %v724_v39  ;;  %1209 = vmatprep.mubr.msk.bf16.mxu1 %vm1380_vm1, %v1379_v8 }
 0x1a7   :  { %1219 = vmatprep.subr.bf16.mxu1 %v1379_v8 }
 0x1ad   :  { %1210 = vmatmul.mubr.msk.bf16.vlgmr.msra.gmra.mrb[20].mxu1 %vm146_vm2, %v717_v29 }
 0x1ae   :  { %1220 = vmatpush3.bf16.xpose.msra.mxu1 %v839_v41  ;;  %1221 = vmatprep.mubr.msk.bf16.mxu1 %vm1380_vm1, %v1379_v8 }
 0x1af   :  { %1231 = vmatprep.subr.bf16.mxu1 %v1379_v8 }
 0x1b5   :  { %1222 = vmatmul.mubr.msk.bf16.vlgmr.msra.gmra.mrb[24].mxu1 %vm146_vm2, %v832_v30 }
 0x1b6   :  { %1232 = vmatpush3.bf16.xpose.msra.mxu1 %v954_v43  ;;  %1233 = vmatprep.mubr.msk.bf16.mxu1 %vm1380_vm1, %v1379_v8 }
 0x1bd   :  { %1234 = vmatmul.mubr.msk.bf16.vlgmr.msra.gmra.mrb[28].mxu1 %vm146_vm2, %v947_v33 }
 0x258   :  { %v187_v44 = vpop.f32.mrb[0].mxu1 }
 0x259   :  { %v1151_v45 = vpop.f32.mrb[1].mxu1  ;;  %v193_v46 = vsel %vm146_vm2, %v187_v44, -inf }
 0x25a   :  { %194 = vmax.xlane.f32.xlu0 %v193_v46  ;;  %v190_v47 = vpop.f32.mrb[2].mxu1 }
 0x25b   :  { %v1152_v48 = vpop.f32.mrb[3].mxu1 }
 0x260   :  { %v300_v49 = vpop.f32.mrb[4].mxu1 }
 0x261   :  { %v1163_v50 = vpop.f32.mrb[5].mxu1  ;;  %v306_v51 = vsel %vm146_vm2, %v300_v49, -inf }
 0x262   :  { %307 = vmax.xlane.f32.xlu1 %v306_v51  ;;  %v303_v52 = vpop.f32.mrb[6].mxu1 }
 0x263   :  { %v1164_v53 = vpop.f32.mrb[7].mxu1 }
 0x268   :  { %v1512_v54 = vpop.f32.mrb[8].mxu1 }
 0x269   :  { %v1175_v55 = vpop.f32.mrb[9].mxu1  ;;  %v422_v11 = vsel %vm146_vm2, %v1512_v54, -inf }
 0x26a   :  { %v419_v56 = vpop.f32.mrb[10].mxu1 }
 0x26b   :  { %v1176_v57 = vpop.f32.mrb[11].mxu1 }
 0x270   :  { %432 = vrot.lane.b32.xlu0 %v1454_v16, %s1390_s19  ;;  %v1516_v58 = vpop.f32.mrb[12].mxu1 }
 0x271   :  { %v1187_v59 = vpop.f32.mrb[13].mxu1  ;;  %v538_v15 = vsel %vm146_vm2, %v1516_v58, -inf }
 0x272   :  { %v535_v60 = vpop.f32.mrb[14].mxu1 }
 0x273   :  { %548 = vrot.lane.b32.xlu1 %v1454_v16, %s1391_s20  ;;  %v1188_v61 = vpop.f32.mrb[15].mxu1 }
 0x278   :  { %v1520_v62 = vpop.f32.mrb[16].mxu1 }
 0x279   :  { %v1199_v63 = vpop.f32.mrb[17].mxu1  ;;  %v654_v17 = vsel %vm146_vm2, %v1520_v62, -inf }
 0x27a   :  { %v651_v0 = vpop.f32.mrb[18].mxu1 }
 0x27b   :  { %v1200_v1 = vpop.f32.mrb[19].mxu1 }
 0x280   :  { %v1522_v2 = vpop.f32.mrb[20].mxu1 }
 0x281   :  { %v1211_v3 = vpop.f32.mrb[21].mxu1  ;;  %v766_v19 = vsel %vm146_vm2, %v1522_v2, -inf }
 0x282   :  { %v763_v4 = vpop.f32.mrb[22].mxu1 }
 0x283   :  { %v1212_v5 = vpop.f32.mrb[23].mxu1 }
 0x288   :  { %v1524_v6 = vpop.f32.mrb[24].mxu1 }
 0x289   :  { %v1223_v7 = vpop.f32.mrb[25].mxu1  ;;  %v881_v20 = vsel %vm146_vm2, %v1524_v6, -inf }
 0x28a   :  { %v878_v9 = vpop.f32.mrb[26].mxu1 }
 0x28b   :  { %v1224_v10 = vpop.f32.mrb[27].mxu1 }
 0x28f   :  { %423 = vmax.xlane.f32.xlu0 %v422_v11 }
 0x290   :  { %v1528_v12 = vpop.f32.mrb[28].mxu1 }
 0x291   :  { %v1235_v13 = vpop.f32.mrb[29].mxu1  ;;  %v996_v21 = vsel %vm146_vm2, %v1528_v12, -inf }
 0x292   :  { %v993_v14 = vpop.f32.mrb[30].mxu1 }
 0x293   :  { %539 = vmax.xlane.f32.xlu0 %v538_v15  ;;  %v1236_v16 = vpop.f32.mrb[31].mxu1 }
 0x297   :  { %655 = vmax.xlane.f32.xlu0 %v654_v17  ;;  %767 = vmax.xlane.f32.xlu1 %v766_v19 }
 0x29b   :  { %882 = vmax.xlane.f32.xlu0 %v881_v20 }
 0x29f   :  { %997 = vmax.xlane.f32.xlu0 %v996_v21 }
 0x2a8   :  { %776 = vrot.lane.b32.xlu1 %v1461_v18, %s1388_s17 }
 0x2ac   :  { %891 = vrot.lane.b32.xlu1 %v1461_v18, %s1390_s19 }
 0x2b0   :  { %1006 = vrot.lane.b32.xlu1 %v1461_v18, %s1391_s20 }
 0x2b5   :  { %664 = vrot.lane.b32.xlu0 %v1461_v18, %s1389_s18 }
 0x2e7   :  { %v195_v23 = vpop.xlane.xlu0 %194 }
 0x2e8   :  { %v196_v24 = vsub.f32 %v187_v44, %v195_v23 }
 0x2ea   :  { %v197_v25 = vmul.f32 1.442695, %v196_v24 }
 0x2eb   :  { %v433_v32 = vpop.permute.xlu0 %432 }
 0x2ec   :  { %1271 = vpow2.f32 %v197_v25  ;;  %v438_v35 = vsel %vm208_vm3, %v433_v32, 0 }
 0x2ef   :  { %v308_v26 = vpop.xlane.xlu1 %307 }
 0x2f0   :  { %v309_v27 = vsub.f32 %v300_v49, %v308_v26 }
 0x2f2   :  { %v310_v28 = vmul.f32 1.442695, %v309_v27 }
 0x2f3   :  { %v549_v39 = vpop.permute.xlu1 %548 }
 0x2f4   :  { %1273 = vpow2.f32 %v310_v28  ;;  %v554_v57 = vsel %vm208_vm3, %v549_v39, 0 }
 0x2f6   :  { %v1272_v29 = vpop.eup %1271 }
 0x2f7   :  { %v202_v30 = vpack.c.bf16 %v1272_v29, %v1272_v29  ;;  %v199_v63 = vsel %vm146_vm2, %v1272_v29, 0.0 }
 0x2f9   :  { %1156 = vmatmul.mubr.msk.bf16.vlgmr.msra.gmra.mrb[4].mxu0 %vm146_vm2, %v202_v30 }
 0x2fa   :  { %1166 = vmatpush3.bf16.msra.mxu0 %v322_v31  ;;  %1167 = vmatprep.mubr.msk.bf16.mxu0 %vm1380_vm1, %v1379_v8 }
 0x2fb   :  { %1177 = vmatprep.subr.bf16.mxu0 %v1379_v8 }
 0x2fe   :  { %v1274_v18 = vpop.eup %1273 }
 0x2ff   :  { %v312_v33 = vsel %vm146_vm2, %v1274_v18, 0.0  ;;  %v315_v34 = vpack.c.bf16 %v1274_v18, %v1274_v18 }
 0x300   :  { %313 = vadd.xlane.f32.xlu1 %v312_v33 }
 0x301   :  { %1168 = vmatmul.mubr.msk.bf16.vlgmr.msra.gmra.mrb[8].mxu0 %vm146_vm2, %v315_v34 }
 0x302   :  { %1178 = vmatpush3.bf16.msra.mxu0 %v438_v35  ;;  %1179 = vmatprep.mubr.msk.bf16.mxu0 %vm1380_vm1, %v1379_v8 }
 0x303   :  { %1189 = vmatprep.subr.bf16.mxu0 %v1379_v8 }
 0x31c   :  { %v424_v36 = vpop.xlane.xlu0 %423 }
 0x31d   :  { %v425_v37 = vsub.f32 %v1512_v54, %v424_v36 }
 0x31f   :  { %v426_v38 = vmul.f32 1.442695, %v425_v37 }
 0x320   :  { %v540_v40 = vpop.xlane.xlu0 %539 }
 0x321   :  { %1275 = vpow2.f32 %v426_v38  ;;  %v541_v41 = vsub.f32 %v1516_v58, %v540_v40 }
 0x323   :  { %v542_v42 = vmul.f32 1.442695, %v541_v41 }
 0x324   :  { %v656_v43 = vpop.xlane.xlu0 %655  ;;  %v768_v44 = vpop.xlane.xlu1 %767 }
 0x325   :  { %1277 = vpow2.f32 %v542_v42  ;;  %v769_v45 = vsub.f32 %v1522_v2, %v768_v44  ;;  %v657_v46 = vsub.f32 %v1520_v62, %v656_v43 }
 0x327   :  { %v770_v47 = vmul.f32 1.442695, %v769_v45  ;;  %v658_v51 = vmul.f32 1.442695, %v657_v46 }
 0x328   :  { %v883_v48 = vpop.xlane.xlu0 %882  ;;  %v777_v7 = vpop.permute.xlu1 %776 }
 0x329   :  { %v884_v49 = vsub.f32 %v1524_v6, %v883_v48  ;;  %1279 = vpow2.f32 %v770_v47  ;;  %v782_v11 = vsel %vm208_vm3, %v777_v7, 0 }
 0x32b   :  { %v1276_v50 = vpop.eup %1275  ;;  %v885_v52 = vmul.f32 1.442695, %v884_v49 }
 0x32c   :  { %v998_v53 = vpop.xlane.xlu0 %997  ;;  %v428_v54 = vsel %vm146_vm2, %v1276_v50, 0.0  ;;  %v431_v55 = vpack.c.bf16 %v1276_v50, %v1276_v50  ;;  %v892_v13 = vpop.permute.xlu1 %891 }
 0x32d   :  { %1281 = vpow2.f32 %v885_v52  ;;  %v999_v56 = vsub.f32 %v1528_v12, %v998_v53  ;;  %429 = vadd.xlane.f32.xlu1 %v428_v54  ;;  %v897_v15 = vsel %vm208_vm3, %v892_v13, 0 }
 0x32e   :  { %1180 = vmatmul.mubr.msk.bf16.vlgmr.msra.gmra.mrb[12].mxu0 %vm146_vm2, %v431_v55  ;;  %1283 = vpow2.f32 %v658_v51 }
 0x32f   :  { %v1278_v58 = vpop.eup %1277  ;;  %v1000_v59 = vmul.f32 1.442695, %v999_v56  ;;  %1190 = vmatpush3.bf16.msra.mxu0 %v554_v57  ;;  %1191 = vmatprep.mubr.msk.bf16.mxu0 %vm1380_vm1, %v1379_v8 }
 0x330   :  { %v544_v60 = vsel %vm146_vm2, %v1278_v58, 0.0  ;;  %1201 = vmatprep.subr.bf16.mxu0 %v1379_v8  ;;  %v665_v61 = vpop.permute.xlu0 %664  ;;  %v547_v0 = vpack.c.bf16 %v1278_v58, %v1278_v58  ;;  %v1007_v16 = vpop.permute.xlu1 %1006 }
 0x331   :  { %1285 = vpow2.f32 %v1000_v59  ;;  %545 = vadd.xlane.f32.xlu1 %v544_v60  ;;  %v670_v2 = vsel %vm208_vm3, %v665_v61, 0  ;;  %v1012_v19 = vsel %vm208_vm3, %v1007_v16, 0 }
 0x333   :  { %v1280_v62 = vpop.eup %1279 }
 0x334   :  { %v772_v1 = vsel %vm146_vm2, %v1280_v62, 0.0  ;;  %v775_v14 = vpack.c.bf16 %v1280_v62, %v1280_v62 }
 0x335   :  { %200 = vadd.xlane.f32.xlu1 %v199_v63  ;;  %773 = vadd.xlane.f32.xlu0 %v772_v1 }
 0x336   :  { %1192 = vmatmul.mubr.msk.bf16.vlgmr.msra.gmra.mrb[16].mxu0 %vm146_vm2, %v547_v0 }
 0x337   :  { %v1282_v3 = vpop.eup %1281  ;;  %1202 = vmatpush3.bf16.msra.mxu0 %v670_v2  ;;  %1203 = vmatprep.mubr.msk.bf16.mxu0 %vm1380_vm1, %v1379_v8 }
 0x338   :  { %v887_v4 = vsel %vm146_vm2, %v1282_v3, 0.0  ;;  %1213 = vmatprep.subr.bf16.mxu0 %v1379_v8  ;;  %v1284_v5 = vpop.eup %1283  ;;  %v890_v17 = vpack.c.bf16 %v1282_v3, %v1282_v3 }
 0x339   :  { %888 = vadd.xlane.f32.xlu0 %v887_v4  ;;  %v663_v10 = vpack.c.bf16 %v1284_v5, %v1284_v5  ;;  %v660_v12 = vsel %vm146_vm2, %v1284_v5, 0.0 }
 0x33b   :  { %v1286_v6 = vpop.eup %1285 }
 0x33c   :  { %v1002_v9 = vsel %vm146_vm2, %v1286_v6, 0.0  ;;  %v1005_v20 = vpack.c.bf16 %v1286_v6, %v1286_v6 }
 0x33d   :  { %1003 = vadd.xlane.f32.xlu0 %v1002_v9 }
 0x33e   :  { %1204 = vmatmul.mubr.msk.bf16.vlgmr.msra.gmra.mrb[20].mxu0 %vm146_vm2, %v663_v10 }
 0x33f   :  { %1214 = vmatpush3.bf16.msra.mxu0 %v782_v11  ;;  %1215 = vmatprep.mubr.msk.bf16.mxu0 %vm1380_vm1, %v1379_v8 }
 0x340   :  { %1225 = vmatprep.subr.bf16.mxu0 %v1379_v8 }
 0x341   :  { %661 = vadd.xlane.f32.xlu0 %v660_v12 }
 0x346   :  { %1216 = vmatmul.mubr.msk.bf16.vlgmr.msra.gmra.mrb[24].mxu0 %vm146_vm2, %v775_v14 }
 0x347   :  { %1226 = vmatpush3.bf16.msra.mxu0 %v897_v15  ;;  %1227 = vmatprep.mubr.msk.bf16.mxu0 %vm1380_vm1, %v1379_v8 }
 0x348   :  { %1237 = vmatprep.subr.bf16.mxu0 %v1379_v8 }
 0x34e   :  { %1228 = vmatmul.mubr.msk.bf16.vlgmr.msra.gmra.mrb[28].mxu0 %vm146_vm2, %v890_v17 }
 0x34f   :  { %1238 = vmatpush3.bf16.msra.mxu0 %v1012_v19  ;;  %1239 = vmatprep.mubr.msk.bf16.mxu0 %vm1380_vm1, %v1379_v8 }
 0x356   :  { %1240 = vmatmul.mubr.msk.bf16.vlgmr.msra.gmra.mrb[32].mxu0 %vm146_vm2, %v1005_v20 }
 0x38d   :  { %v314_v21 = vpop.xlane.xlu1 %313 }
 0x3ba   :  { %v430_v22 = vpop.xlane.xlu1 %429 }
 0x3be   :  { %v546_v23 = vpop.xlane.xlu1 %545 }
 0x3c2   :  { %v201_v24 = vpop.xlane.xlu1 %200  ;;  %v774_v35 = vpop.xlane.xlu0 %773 }
 0x3c3   :  { %1287 = vrcp.f32 %v201_v24 }
 0x3c4   :  { %1289 = vrcp.f32 %v314_v21 }
 0x3c5   :  { %1291 = vrcp.f32 %v430_v22 }
 0x3c6   :  { %v889_v36 = vpop.xlane.xlu0 %888  ;;  %1293 = vrcp.f32 %v546_v23 }
 0x3ca   :  { %v1004_v37 = vpop.xlane.xlu0 %1003 }
 0x3cc   :  { %v246_v25 = vpop.f32.mrb[4].mxu0 }
 0x3cd   :  { %v1288_v26 = vpop.eup %1287  ;;  %v1157_v27 = vpop.f32.mrb[5].mxu0 }
 0x3ce   :  { %v253_v28 = vmul.f32 %v1288_v26, %v246_v25  ;;  %v249_v29 = vpop.f32.mrb[6].mxu0  ;;  %v1290_v31 = vpop.eup %1289 }
 0x3cf   :  { %v1158_v30 = vpop.f32.mrb[7].mxu0  ;;  %v1292_v38 = vpop.eup %1291 }
 0x3d0   :  { %254 = vst.msk [vmem:[#allocation7] sm:$0xff] %vm146_vm2, %v253_v28  ;;  %v662_v43 = vpop.xlane.xlu0 %661  ;;  %v1294_v45 = vpop.eup %1293 }
 0x3d1   :  { %1295 = vrcp.f32 %v662_v43 }
 0x3d2   :  { %1297 = vrcp.f32 %v774_v35 }
 0x3d3   :  { %1299 = vrcp.f32 %v889_v36 }
 0x3d4   :  { %v358_v18 = vpop.f32.mrb[8].mxu0  ;;  %1301 = vrcp.f32 %v1004_v37 }
 0x3d5   :  { %v365_v8 = vmul.f32 %v1290_v31, %v358_v18  ;;  %v1169_v32 = vpop.f32.mrb[9].mxu0 }
 0x3d6   :  { %v361_v33 = vpop.f32.mrb[10].mxu0 }
 0x3d7   :  { %v1170_v34 = vpop.f32.mrb[11].mxu0  ;;  %367 = vrot.lane.b32.xlu1 %v365_v8, %s1377_s23 }
 0x3db   :  { %v1296_v51 = vpop.eup %1295 }
 0x3dc   :  { %v1298_v57 = vpop.eup %1297 }
 0x3dd   :  { %v1300_v63 = vpop.eup %1299 }
 0x3de   :  { %v1302_v5 = vpop.eup %1301 }
 0x401   :  { %v474_v39 = vpop.f32.mrb[12].mxu0 }
 0x402   :  { %v481_v40 = vmul.f32 %v1292_v38, %v474_v39  ;;  %v1181_v41 = vpop.f32.mrb[13].mxu0 }
 0x403   :  { %v477_v42 = vpop.f32.mrb[14].mxu0 }
 0x404   :  { %v1182_v44 = vpop.f32.mrb[15].mxu0  ;;  %483 = vrot.lane.b32.xlu1 %v481_v40, %s1392_s21 }
 0x409   :  { %v590_v46 = vpop.f32.mrb[16].mxu0 }
 0x40a   :  { %v597_v47 = vmul.f32 %v1294_v45, %v590_v46  ;;  %v1193_v48 = vpop.f32.mrb[17].mxu0 }
 0x40b   :  { %v593_v49 = vpop.f32.mrb[18].mxu0 }
 0x40c   :  { %v1194_v50 = vpop.f32.mrb[19].mxu0 }
 0x411   :  { %v706_v52 = vpop.f32.mrb[20].mxu0 }
 0x412   :  { %v713_v53 = vmul.f32 %v1296_v51, %v706_v52  ;;  %v1205_v54 = vpop.f32.mrb[21].mxu0 }
 0x413   :  { %v709_v55 = vpop.f32.mrb[22].mxu0 }
 0x414   :  { %715 = vst.msk [vmem:[#allocation7 + $0x8] sm:$0xff] %vm146_vm2, %v713_v53  ;;  %v1206_v56 = vpop.f32.mrb[23].mxu0 }
 0x419   :  { %v818_v58 = vpop.f32.mrb[24].mxu0 }
 0x41a   :  { %v825_v59 = vmul.f32 %v1298_v57, %v818_v58  ;;  %v1217_v60 = vpop.f32.mrb[25].mxu0 }
 0x41b   :  { %v821_v61 = vpop.f32.mrb[26].mxu0 }
 0x41c   :  { %v1218_v62 = vpop.f32.mrb[27].mxu0  ;;  %827 = vrot.lane.b32.xlu0 %v825_v59, %s1377_s23 }
 0x420   :  { %599 = vrot.lane.b32.xlu0 %v597_v47, %s1393_s24 }
 0x421   :  { %v933_v0 = vpop.f32.mrb[28].mxu0 }
 0x422   :  { %v940_v1 = vmul.f32 %v1300_v63, %v933_v0  ;;  %v1229_v2 = vpop.f32.mrb[29].mxu0 }
 0x423   :  { %v936_v3 = vpop.f32.mrb[30].mxu0 }
 0x424   :  { %v1230_v4 = vpop.f32.mrb[31].mxu0  ;;  %942 = vrot.lane.b32.xlu1 %v940_v1, %s1392_s21 }
 0x429   :  { %v1048_v6 = vpop.f32.mrb[32].mxu0 }
 0x42a   :  { %v1055_v7 = vmul.f32 %v1302_v5, %v1048_v6  ;;  %v1241_v9 = vpop.f32.mrb[33].mxu0 }
 0x42b   :  { %v1051_v10 = vpop.f32.mrb[34].mxu0 }
 0x42c   :  { %v1242_v11 = vpop.f32.mrb[35].mxu0  ;;  %1057 = vrot.lane.b32.xlu1 %v1055_v7, %s1393_s24 }
 0x449   :  { %v368_v12 = vpop.permute.xlu1 %367 }
 0x44a   :  { %371 = vst.msk [vmem:[#allocation7] sm:$0xff] %vm370_vm4, %v368_v12 }
 0x476   :  { %v484_v13 = vpop.permute.xlu1 %483 }
 0x477   :  { %487 = vst.msk [vmem:[#allocation7] sm:$0xff] %vm486_vm5, %v484_v13 }
 0x48e   :  { %v828_v14 = vpop.permute.xlu0 %827 }
 0x48f   :  { %830 = vst.msk [vmem:[#allocation7 + $0x8] sm:$0xff] %vm370_vm4, %v828_v14 }
 0x492   :  { %v600_v15 = vpop.permute.xlu0 %599 }
 0x493   :  { %603 = vst.msk [vmem:[#allocation7] sm:$0xff] %vm602_vm6, %v600_v15 }
 0x496   :  { %v943_v16 = vpop.permute.xlu1 %942 }
 0x497   :  { %945 = vst.msk [vmem:[#allocation7 + $0x8] sm:$0xff] %vm486_vm5, %v943_v16 }
 0x49e   :  { %v1058_v17 = vpop.permute.xlu1 %1057 }
 0x49f   :  { %1060 = vst.msk [vmem:[#allocation7 + $0x8] sm:$0xff] %vm602_vm6, %v1058_v17 }
 0x4a0   :  { %1358 = shalt.err (!%p1355_p6)
}
 0x4a1   :  { %s1359_s30 = scalar_lea.hbm %s1621_s3, 256 }
 0x4a2   :  { %p1360_p7 = scmp.ne.s32.totalorder %s1621_s3, %s1359_s30  ;;  %p1363_p8 = scmp.lt.u32.totalorder %s1359_s30, %s1621_s3 }
 0x4a4   :  { %p1365_p9 = pnand %p1363_p8, %p1360_p7 }
 0x4a6   :  { %1368 = shalt.err (!%p1365_p9)
}
 0x4a7   :  { %1072 = dma.vmem_to_hbm [thread:$0]  %s1067_s26, 256, %s1621_s3, [#allocation4], %s1376_s22, %s1376_s22, %s1377_s23  }
 0x4a8   :  { %1373 = dma.done.wait [#allocation4], 256  }
 0x4a9   :  { %1374 = vsyncadd [#allocation4], 4294967040 }
 0x4aa   :  { %1076 = vsyncpa [#allocation3], 1 }
 0x4ab   :  { %1077 = vsyncpa [#allocation6], 1 }
 0x4ac   :  { %1078 = vsyncpa [#allocation4], 1 }

</bundles_post_ra>
